<compile_context>
chip_gen: v7x
topology: tpu7x:2x2x1
jax: 0.10.0
libtpu: 0.0.40
codegen_flags: <defaults>
</compile_context>

<pallas_src>
import functools

import jax
import jax.numpy as jnp
from jax import lax
from jax.experimental import pallas as pl
from jax.experimental.pallas import tpu as pltpu

VOCAB_SIZE = 50
EMBEDDING_DIM = 16
CONTEXT_SIZE = 2
HIDDEN = 128
V_PAD = 128                         # vocab padded to a full 128-lane tile
CV = CONTEXT_SIZE * VOCAB_SIZE      # stacked one-hot contraction dim (100)
TB_MAX = 128                        # batch rows per grid step (sweet spot 128-256)
NEG_INF = -1e30


def ngram_kernel(idx_ref, p_ref, b1_ref, w2_ref, b2_ref, out_ref):
    tb = idx_ref.shape[0]
    cv = p_ref.shape[0]                      # CONTEXT_SIZE * VOCAB_SIZE
    vocab = cv // CONTEXT_SIZE
    mm_dtype = p_ref.dtype
    # f32 params -> exact multi-pass MXU path; bf16 params -> native bf16 MXU.
    prec = lax.Precision.HIGHEST if mm_dtype == jnp.float32 else None

    # Fused embedding gather + linear1 as ONE stacked one-hot matmul:
    #   onehot (tb, C*V) has a 1 at column c*V + token_c for each context slot,
    #   P (C*V, H) = concat_c(emb @ w1[:, c*E:(c+1)*E].T)  (precomputed),
    #   so onehot @ P == sum_c emb[token_c] @ w1_c.T == linear1(embeds) - b1.
    col = lax.broadcasted_iota(jnp.int32, (tb, cv), 1)       # built once, reused
    oh = None
    for c in range(CONTEXT_SIZE):                            # static unroll (C=2)
        tgt = idx_ref[:, c:c + 1] + c * vocab                # (tb, 1) int32
        hit = (col == tgt)
        oh = hit if oh is None else (oh | hit)               # targets never collide
    onehot = oh.astype(mm_dtype)                             # exact in bf16 too

    h = jnp.dot(onehot, p_ref[...],
                preferred_element_type=jnp.float32,
                precision=prec) + b1_ref[...]                # (tb, H) f32
    h = jnp.maximum(h, 0.0)                                  # relu in f32

    # linear2: contract against PyTorch-layout (V_PAD, H) weight (NT matmul,
    # no transpose).  Padded vocab lanes carry bias -1e30 (baked in b2_pad),
    # so no in-kernel mask is needed before the max / logsumexp.
    logits = lax.dot_general(h.astype(mm_dtype), w2_ref[...],
                             dimension_numbers=(((1,), (1,)), ((), ())),
                             preferred_element_type=jnp.float32,
                             precision=prec) + b2_ref[...]   # (tb, V_PAD) f32

    # Numerically stable log_softmax over the (padded) vocab lanes, all f32.
    m = jnp.max(logits, axis=1, keepdims=True)
    lse = m + jnp.log(jnp.sum(jnp.exp(logits - m), axis=1, keepdims=True))
    out_ref[...] = logits - lse                              # lane-dense (tb, 128) store


def prepare_params(emb_table, w1, b1, w2, b2, *, matmul_dtype=jnp.float32):
    """One-time layout prep (hoisted out of the per-call path).

    * P (C*V, H): row c*V + t is emb[t] @ w1[:, c*E:(c+1)*E].T, fusing the
      embedding gather and linear1 into one full 128-lane one-hot matmul.
    * w2 vocab axis zero-padded to 128; b2 pad lanes set to -1e30 so padded
      logits come out of the bias add already masked.
    * Matmul operands optionally stored in bf16 (native MXU dtype on
      v5e/v6e/v7x); biases stay f32 (elementwise math stays f32).
    """
    pieces = []
    for c in range(CONTEXT_SIZE):
        w1_c = w1[:, c * EMBEDDING_DIM:(c + 1) * EMBEDDING_DIM]          # (H, E)
        pieces.append(jnp.dot(emb_table, w1_c.T, precision=lax.Precision.HIGHEST))
    p = jnp.concatenate(pieces, axis=0).astype(matmul_dtype)            # (C*V, H)
    b1_2d = b1.reshape(1, HIDDEN).astype(jnp.float32)
    w2_pad = jnp.pad(w2, ((0, V_PAD - VOCAB_SIZE), (0, 0))).astype(matmul_dtype)
    b2_pad = jnp.full((1, V_PAD), NEG_INF, jnp.float32)
    b2_pad = b2_pad.at[0, :VOCAB_SIZE].set(b2.astype(jnp.float32))
    return p, b1_2d, w2_pad, b2_pad


@functools.partial(jax.jit, static_argnames=("tb",))
def _ngram_pallas(idx2d, p, b1_2d, w2_pad, b2_pad, *, tb):
    bpad = idx2d.shape[0]
    return pl.pallas_call(
        ngram_kernel,
        out_shape=jax.ShapeDtypeStruct((bpad, V_PAD), jnp.float32),
        grid=(bpad // tb,),
        in_specs=[
            pl.BlockSpec((tb, CONTEXT_SIZE), lambda i: (i, 0)),   # token ids
            pl.BlockSpec((CV, HIDDEN), lambda i: (0, 0)),         # fused embed+linear1 table
            pl.BlockSpec((1, HIDDEN), lambda i: (0, 0)),          # linear1.bias
            pl.BlockSpec((V_PAD, HIDDEN), lambda i: (0, 0)),      # padded linear2.weight
            pl.BlockSpec((1, V_PAD), lambda i: (0, 0)),           # padded/masked linear2.bias
        ],
        out_specs=pl.BlockSpec((tb, V_PAD), lambda i: (i, 0)),
        compiler_params=pltpu.CompilerParams(
            dimension_semantics=("parallel",)),                   # batch axis -> both TCs
    )(idx2d, p, b1_2d, w2_pad, b2_pad)


def _choose_tb(b):
    """Batch tile: multiple of 8, capped at TB_MAX, and >= 2 grid steps when
    the batch allows it (so v7x's second TensorCore gets a share)."""
    bpad8 = max(8, -(-b // 8) * 8)
    tb = min(TB_MAX, bpad8)
    if bpad8 >= 16 and bpad8 // tb < 2:
        tb = max(8, (bpad8 // 2 + 7) // 8 * 8)
    return tb


def ngram_forward(idx, params, *, tb=None):
    """idx: (CONTEXT_SIZE,) like the PyTorch module, or (B, CONTEXT_SIZE) for a
    batch of contexts.  Returns (1, V) / (B, V) log-probabilities.
    Note: out-of-range token ids give an all-zero one-hot (zero embedding)
    instead of raising like nn.Embedding (fine for trusted inputs)."""
    idx2d = idx.reshape(1, -1) if idx.ndim == 1 else idx
    b = idx2d.shape[0]
    if tb is None:
        tb = _choose_tb(b)
    bpad = -(-b // tb) * tb
    if bpad != b:
        idx2d = jnp.pad(idx2d, ((0, bpad - b), (0, 0)))           # pad rows with token 0
    out = _ngram_pallas(idx2d, *params, tb=tb)
    return out[:b, :VOCAB_SIZE]


def ngram_reference(idx2d, emb_table, w1, b1, w2, b2):
    embeds = emb_table[idx2d].reshape(idx2d.shape[0], -1)         # (B, C*E)
    h = jnp.maximum(jnp.dot(embeds, w1.T, precision=lax.Precision.HIGHEST) + b1, 0.0)
    logits = jnp.dot(h, w2.T, precision=lax.Precision.HIGHEST) + b2
    return jax.nn.log_softmax(logits, axis=-1)


if __name__ == "__main__":
    key = jax.random.PRNGKey(0)
    k_emb, k_w1, k_b1, k_w2, k_b2, k_idx = jax.random.split(key, 6)

    # Deterministic parameter init (shapes match nn.Embedding / nn.Linear).
    emb_table = jax.random.normal(k_emb, (VOCAB_SIZE, EMBEDDING_DIM), jnp.float32)
    in1 = CONTEXT_SIZE * EMBEDDING_DIM
    bound1 = 1.0 / jnp.sqrt(in1)
    w1 = jax.random.uniform(k_w1, (HIDDEN, in1), jnp.float32, -bound1, bound1)
    b1 = jax.random.uniform(k_b1, (HIDDEN,), jnp.float32, -bound1, bound1)
    bound2 = 1.0 / jnp.sqrt(HIDDEN)
    w2 = jax.random.uniform(k_w2, (VOCAB_SIZE, HIDDEN), jnp.float32, -bound2, bound2)
    b2 = jax.random.uniform(k_b2, (VOCAB_SIZE,), jnp.float32, -bound2, bound2)

    # Batched: 16 contexts -> tb=8, grid of 2 "parallel" steps.
    B = 16
    idx_batch = jax.random.randint(k_idx, (B, CONTEXT_SIZE), 0, VOCAB_SIZE, jnp.int32)
    ref_batch = ngram_reference(idx_batch, emb_table, w1, b1, w2, b2)

    # Exact f32 path (Precision.HIGHEST): tight parity with the f32 reference.
    params_f32 = prepare_params(emb_table, w1, b1, w2, b2, matmul_dtype=jnp.float32)
    out_batch = jax.block_until_ready(ngram_forward(idx_batch, params_f32))
    assert out_batch.shape == (B, VOCAB_SIZE)
    assert jnp.allclose(out_batch, ref_batch, atol=2e-5, rtol=2e-5), "f32 batched mismatch"

    # Single-context call: exactly the module's forward(inputs) -> (1, V).
    idx_single = idx_batch[0]
    out_single = jax.block_until_ready(ngram_forward(idx_single, params_f32))
    assert out_single.shape == (1, VOCAB_SIZE)
    assert jnp.allclose(out_single, ref_batch[0:1], atol=2e-5, rtol=2e-5), "single mismatch"

    # Fast bf16-operand MXU path (v5e/v6e/v7x native); elementwise math stays f32.
    params_bf16 = prepare_params(emb_table, w1, b1, w2, b2, matmul_dtype=jnp.bfloat16)
    out_bf16 = jax.block_until_ready(ngram_forward(idx_batch, params_bf16))
    assert out_bf16.shape == (B, VOCAB_SIZE)
    assert jnp.allclose(out_bf16, ref_batch, atol=5e-2, rtol=5e-2), "bf16 batched mismatch"

    print("KERNEL_OK")
</pallas_src>

<mosaic_0001>
module attributes {stable_mosaic.version = 11 : i64} {
  func.func @ngram_kernel(%arg0: i32, %arg1: memref<8x2xi32, #tpu.memory_space<vmem>>, %arg2: memref<100x128xf32, #tpu.memory_space<vmem>>, %arg3: memref<1x128xf32, #tpu.memory_space<vmem>>, %arg4: memref<128x128xf32, #tpu.memory_space<vmem>>, %arg5: memref<1x128xf32, #tpu.memory_space<vmem>>, %arg6: memref<8x128xf32, #tpu.memory_space<vmem>>) attributes {dimension_semantics = [#tpu.dimension_semantics<parallel>], iteration_bounds = array<i64: 2>, scalar_prefetch = 0 : i64, scratch_operands = 0 : i64, tpu.core_type = #tpu.core_type<tc>, window_params = [{transform_indices = @transform_0, window_bounds = array<i64: 8, 2>}, {pipeline_mode = #tpu.pipeline_mode<synchronous>, transform_indices = @transform_1, window_bounds = array<i64: 100, 128>}, {pipeline_mode = #tpu.pipeline_mode<synchronous>, transform_indices = @transform_2, window_bounds = array<i64: 1, 128>}, {pipeline_mode = #tpu.pipeline_mode<synchronous>, transform_indices = @transform_3, window_bounds = array<i64: 128, 128>}, {pipeline_mode = #tpu.pipeline_mode<synchronous>, transform_indices = @transform_4, window_bounds = array<i64: 1, 128>}, {transform_indices = @transform_5, window_bounds = array<i64: 8, 128>}]} {
    %0 = tpu.iota {dimensions = array<i32: 1>} : vector<8x100xi32>
    %c0 = arith.constant 0 : index
    %c0_0 = arith.constant 0 : index
    %1 = vector.load %arg1[%c0, %c0_0] : memref<8x2xi32, #tpu.memory_space<vmem>>, vector<8x1xi32>
    %c0_i32 = arith.constant 0 : i32
    %2 = vector.broadcast %c0_i32 : i32 to vector<8x1xi32>
    %3 = arith.addi %1, %2 : vector<8x1xi32>
    %4 = vector.broadcast %3 : vector<8x1xi32> to vector<8x100xi32>
    %5 = arith.cmpi eq, %0, %4 : vector<8x100xi32>
    %c0_1 = arith.constant 0 : index
    %c1 = arith.constant 1 : index
    %6 = vector.load %arg1[%c0_1, %c1] : memref<8x2xi32, #tpu.memory_space<vmem>>, vector<8x1xi32>
    %c50_i32 = arith.constant 50 : i32
    %7 = vector.broadcast %c50_i32 : i32 to vector<8x1xi32>
    %8 = arith.addi %6, %7 : vector<8x1xi32>
    %9 = vector.broadcast %8 : vector<8x1xi32> to vector<8x100xi32>
    %10 = arith.cmpi eq, %0, %9 : vector<8x100xi32>
    %11 = arith.ori %5, %10 : vector<8x100xi1>
    %12 = arith.extui %11 : vector<8x100xi1> to vector<8x100xi32>
    %13 = arith.sitofp %12 : vector<8x100xi32> to vector<8x100xf32>
    %c0_2 = arith.constant 0 : index
    %c0_3 = arith.constant 0 : index
    %14 = vector.load %arg2[%c0_2, %c0_3] : memref<100x128xf32, #tpu.memory_space<vmem>>, vector<100x128xf32>
    %cst = arith.constant dense<0.000000e+00> : vector<8x128xf32>
    %15 = tpu.matmul %13, %14, %cst {dimension_numbers = #tpu.dot_dimension_numbers<[1], [0], [0], [1], [0, 0, 1, 1], [], []>, precision = #tpu.contract_precision<fp32>} : vector<8x100xf32>, vector<100x128xf32>, vector<8x128xf32> -> vector<8x128xf32>
    %c0_4 = arith.constant 0 : index
    %c0_5 = arith.constant 0 : index
    %16 = vector.load %arg3[%c0_4, %c0_5] : memref<1x128xf32, #tpu.memory_space<vmem>>, vector<1x128xf32>
    %17 = vector.broadcast %16 : vector<1x128xf32> to vector<8x128xf32>
    %18 = arith.addf %15, %17 : vector<8x128xf32>
    %cst_6 = arith.constant 0.000000e+00 : f32
    %19 = vector.broadcast %cst_6 : f32 to vector<8x128xf32>
    %20 = arith.maximumf %18, %19 : vector<8x128xf32>
    %c0_7 = arith.constant 0 : index
    %c0_8 = arith.constant 0 : index
    %21 = vector.load %arg4[%c0_7, %c0_8] : memref<128x128xf32, #tpu.memory_space<vmem>>, vector<128x128xf32>
    %cst_9 = arith.constant dense<0.000000e+00> : vector<8x128xf32>
    %22 = tpu.matmul %20, %21, %cst_9 {dimension_numbers = #tpu.dot_dimension_numbers<[1], [1], [0], [0], [0, 0, 1, 0], [], []>, precision = #tpu.contract_precision<fp32>} : vector<8x128xf32>, vector<128x128xf32>, vector<8x128xf32> -> vector<8x128xf32>
    %c0_10 = arith.constant 0 : index
    %c0_11 = arith.constant 0 : index
    %23 = vector.load %arg5[%c0_10, %c0_11] : memref<1x128xf32, #tpu.memory_space<vmem>>, vector<1x128xf32>
    %24 = vector.broadcast %23 : vector<1x128xf32> to vector<8x128xf32>
    %25 = arith.addf %22, %24 : vector<8x128xf32>
    %cst_12 = arith.constant dense<0xFF800000> : vector<8xf32>
    %26 = vector.multi_reduction <maximumf>, %25, %cst_12 [1] : vector<8x128xf32> to vector<8xf32>
    %27 = vector.shape_cast %26 : vector<8xf32> to vector<8x1xf32>
    %28 = vector.broadcast %27 : vector<8x1xf32> to vector<8x128xf32>
    %29 = arith.subf %25, %28 : vector<8x128xf32>
    %30 = math.exp %29 : vector<8x128xf32>
    %cst_13 = arith.constant dense<0.000000e+00> : vector<8xf32>
    %31 = vector.multi_reduction <add>, %30, %cst_13 [1] : vector<8x128xf32> to vector<8xf32>
    %32 = vector.shape_cast %31 : vector<8xf32> to vector<8x1xf32>
    %33 = math.log %32 : vector<8x1xf32>
    %34 = arith.addf %27, %33 : vector<8x1xf32>
    %35 = vector.broadcast %34 : vector<8x1xf32> to vector<8x128xf32>
    %36 = arith.subf %25, %35 : vector<8x128xf32>
    %c0_14 = arith.constant 0 : index
    %c0_15 = arith.constant 0 : index
    %37 = vector.load %arg6[%c0_14, %c0_15] : memref<8x128xf32, #tpu.memory_space<vmem>>, vector<8x128xf32>
    tpu.vector_store %arg6[%c0_14, %c0_15], %36 {strides = array<i32>} : memref<8x128xf32, #tpu.memory_space<vmem>>, vector<8x128xf32>,
    return
  }
  func.func @transform_0(%arg0: i32) -> (i32, i32) {
    %c0_i32 = arith.constant 0 : i32
    %c0_i32_0 = arith.constant 0 : i32
    return %arg0, %c0_i32 : i32, i32
  }
  func.func @transform_1(%arg0: i32) -> (i32, i32) {
    %c0_i32 = arith.constant 0 : i32
    %c0_i32_0 = arith.constant 0 : i32
    %c0_i32_1 = arith.constant 0 : i32
    return %c0_i32, %c0_i32_0 : i32, i32
  }
  func.func @transform_2(%arg0: i32) -> (i32, i32) {
    %c0_i32 = arith.constant 0 : i32
    %c0_i32_0 = arith.constant 0 : i32
    %c0_i32_1 = arith.constant 0 : i32
    return %c0_i32, %c0_i32_0 : i32, i32
  }
  func.func @transform_3(%arg0: i32) -> (i32, i32) {
    %c0_i32 = arith.constant 0 : i32
    %c0_i32_0 = arith.constant 0 : i32
    %c0_i32_1 = arith.constant 0 : i32
    return %c0_i32, %c0_i32_0 : i32, i32
  }
  func.func @transform_4(%arg0: i32) -> (i32, i32) {
    %c0_i32 = arith.constant 0 : i32
    %c0_i32_0 = arith.constant 0 : i32
    %c0_i32_1 = arith.constant 0 : i32
    return %c0_i32, %c0_i32_0 : i32, i32
  }
  func.func @transform_5(%arg0: i32) -> (i32, i32) {
    %c0_i32 = arith.constant 0 : i32
    %c0_i32_0 = arith.constant 0 : i32
    return %arg0, %c0_i32 : i32, i32
  }
}

</mosaic_0001>

<bundles_post_ra>
// kernel: _ngram_pallas.1
= control target key start
LH: loop header
LB: loop body
LE: loop exit
PB: predicated region body
PF: predicated region fallthrough
CT: control target
= control target key end

     0   :  { %10 = vsyncpa [#allocation3], 0  ;;  %s3397_s0 = inlined_call_operand.vmem [shape: s32[16,2], index: 0, kind: input, shape index: {}]   ;;  %s3398_s1 = inlined_call_operand.hbm [shape: f32[100,128], index: 1, kind: input, shape index: {}]   ;;  %s3399_s2 = inlined_call_operand.vmem [shape: f32[1,128], index: 2, kind: input, shape index: {}]   ;;  %s3400_s3 = inlined_call_operand.hbm [shape: f32[128,128], index: 3, kind: input, shape index: {}]   ;;  %s3401_s4 = inlined_call_operand.vmem [shape: f32[1,128], index: 4, kind: input, shape index: {}]   ;;  %s3402_s5 = inlined_call_operand.hbm [shape: f32[16,128], index: 5, kind: output, shape index: {}]  }
   0x1   :  { %11 = vsyncpa [#allocation6], 0 }
   0x2   :  { %12 = vsyncpa [#allocation4], 0 }
   0x3   :  { %14 = vsyncpa [#allocation4 + $0x1], 0  ;;  %s2770_s18 = smov 0   ;;  %s2772_s19 = smov 0  }
   0x4   :  { %s2774_s20 = smov 0   ;;  %s2776_s21 = smov 0  }
   0x5 LB: > { %s2791_s22 = sadd.s32 4294967295, %s2728_s21   ;;  %s1667_s23 = sadd.s32 4294967294, %s2728_s21   ;;  %s2728_s21 = sphi %s2776_s21, %s3420_s21   ;;  %s2724_s20 = sphi %s2774_s20, %s3419_s20   ;;  %s2720_s19 = sphi %s2772_s19, %s3418_s19   ;;  %s2716_s18 = sphi %s2770_s18, %s3417_s18  }
   0x6   : > { %s2795_s24 = sadd.s32 1, %s2728_s21   ;;  %s137_s25 = sadd.s32 1, %s2724_s20 }
   0x7   : > { %s134_s26 = ssub.s32 %s2728_s21, %s2795_s24  ;;  %p147_p0 = scmp.ne.s32.totalorder %s2724_s20, %s2720_s19 }
   0x8   : > { %p135_p1 = scmp.eq.s32.totalorder %s134_s26, 0  ;;  %p148_p2 = scmp.eq.s32.totalorder %s2791_s22, 1 }
   0x9   : > { %p153_p3 = scmp.ne.s32.totalorder %s2720_s19, %s2716_s18  ;;  %p154_p4 = scmp.eq.s32.totalorder %s1667_s23, 1 }
   0xa   : > { %s2806_s27 = scalar_select %p135_p1, %s2724_s20, %s137_s25  }
   0xb   : > { %p2808_p5 = por %p148_p2, %p147_p0  ;;  %p2812_p6 = por %p154_p4, %p153_p3 }
   0xc   : > { %p1668_p7 = scmp.ge.s32.totalorder %s2728_s21, 1  ;;  %p161_p8 = scmp.lt.s32.totalorder %s2728_s21, 3 }
   0xd   : > { %s3406_s28 = scalar_select %p2808_p5, 1, 0 }
   0xe   : > { %s3407_s29 = scalar_select %p2812_p6, 1, 0 }
   0xf   : > { %p3403_p9 = scmp.eq.s32.totalorder %s2791_s22, 0  ;;  %p2819_p10 = pnand %p1668_p7, %p161_p8 }
  0x10   : > { %s2730_s6 = smov [#allocation2]   ;;  %s2731_s9 = smov [#allocation5]  }
  0x11   : > { %s3408_s30 = scalar_select %p2819_p10, 1, 0 }
  0x12   : > { %s173_s7 = sshll.u32 %s2730_s6, 4  ;;  %p2539_p11 = pneg %p2819_p10  ;;  %s174_s7 = int_to_ptr.vmem [resolvable:$true] %s173_s7 }
  0x13   : > { %s189_s10 = sshll.u32 %s2731_s9, 4  ;;  %s2602_s13 = scalar_lea.hbm %s3398_s1, 1664  ;;  %s2831_s10 = int_to_ptr.vmem [resolvable:$true] %s189_s10 }
  0x14   : > { %p2827_p12 = pnand %p3403_p9, %p2539_p11  ;;  %p2603_p13 = scmp.ne.s32.totalorder %s3398_s1, %s2602_s13 }
  0x15   : > { %p2609_p3 = scmp.lt.u32.totalorder %s2602_s13, %s3398_s1 }
  0x16   : > { %p2604_p0 = pneg %p2827_p12 }
  0x18   : > { %p2605_p1 = pnand %p2604_p0, %p2603_p13 }
  0x1a   : > { %p2606_p2 = pneg %p2605_p1 }
  0x1c   : > { %p2611_p4 = pnand %p2609_p3, %p2606_p2 }
  0x1e   : > { %2614 = shalt.err (!%p2611_p4)
}
  0x1f   : > { %s2615_s23 = scalar_lea.vmem %s174_s7, 1664  ;;  %p2623_p9 = scmp.lt.s32.totalorder %s174_s7, %s174_s7 }
  0x20   : > { %p2616_p7 = scmp.ne.s32.totalorder %s174_s7, %s2615_s23  ;;  %p2624_p6 = scmp.lt.s32.totalorder %s2615_s23, %s2615_s23 }
  0x22   : > { %p2618_p8 = pnand %p2616_p7, %p2604_p0  ;;  %p2625_p5 = por %p2624_p6, %p2623_p9 }
  0x24   : > { %p2619_p11 = pneg %p2618_p8 }
  0x26   : > { %p2626_p10 = pnand %p2625_p5, %p2619_p11 }
  0x28   : > { %2629 = shalt.err (!%p2626_p10)
}
  0x29   : > { %s2732_s25 = smov 128   ;;  %s2733_s26 = smov 8  }
  0x2a   : > { %2542 = dma.hbm_to_vmem [thread:$0]  (!%p2827_p12), %s3398_s1, 1664, %s174_s7, [#allocation3], %s2732_s25, %s2732_s25, %s2733_s26  }
  0x2b   : > { %s2630_s13 = scalar_lea.hbm %s3400_s3, 2048 }
  0x2c   : > { %p2631_p13 = scmp.ne.s32.totalorder %s3400_s3, %s2630_s13  ;;  %p2637_p9 = scmp.lt.u32.totalorder %s2630_s13, %s3400_s3 }
  0x2e   : > { %p2633_p5 = pnand %p2631_p13, %p2604_p0 }
  0x30   : > { %p2634_p6 = pneg %p2633_p5 }
  0x32   : > { %p2639_p10 = pnand %p2637_p9, %p2634_p6 }
  0x34   : > { %2642 = shalt.err (!%p2639_p10)
}
  0x35   : > { %s2643_s7 = scalar_lea.vmem %s2831_s10, 2048  ;;  %p2651_p4 = scmp.lt.s32.totalorder %s2831_s10, %s2831_s10 }
  0x36   : > { %p2644_p1 = scmp.ne.s32.totalorder %s2831_s10, %s2643_s7  ;;  %p2652_p7 = scmp.lt.s32.totalorder %s2643_s7, %s2643_s7 }
  0x38   : > { %p2646_p2 = pnand %p2644_p1, %p2604_p0  ;;  %p2653_p8 = por %p2652_p7, %p2651_p4 }
  0x3a   : > { %p2647_p3 = pneg %p2646_p2 }
  0x3c   : > { %p2654_p11 = pnand %p2653_p8, %p2647_p3 }
  0x3e   : > { %2657 = shalt.err (!%p2654_p11)
}
  0x3f   : > { %2545 = dma.hbm_to_vmem [thread:$0]  (!%p2827_p12), %s3400_s3, 2048, %s2831_s10, [#allocation6], %s2732_s25, %s2732_s25, %s2733_s26  }
  0x40   : > { %p3410_p13 = scmp.ne.s32.totalorder %s3408_s30, 0 }
  0x41   : > { %p3411_p5 = scmp.eq.s32.totalorder (!%p3410_p13), %s2791_s22, 0 }
  0x42   : > { %215 = sbr.rel (%p3410_p13) target bundleno = 1281 (0x501), region = 40 }
  0x49   : > { %2703 = dma.done.wait (%p3411_p5), [#allocation3], 1664   ;;  %p3412_p0 = pmov %p3411_p5 }
  0x4b   : > { %2705 = vsyncadd (%p3412_p0), [#allocation3], 4294965632  ;;  %p3413_p6 = pmov %p3412_p0 }
  0x4c   : > { %p3414_p9 = pmov %p3412_p0 }
  0x4d   : > { %2707 = dma.done.wait (%p3413_p6), [#allocation6], 2048  }
  0x4e   : > { %2709 = vsyncadd (%p3414_p9), [#allocation6], 4294965248  ;;  %p246_p10 = scmp.lt.s32.totalorder %s2791_s22, 1  ;;  %v2734_v0 = vmov 0   ;;  %v2735_v1 = vmov 0.0|0.0   ;;  %v265_v3 = vld [vmem:[#allocation2] sm:$0xff] }
  0x4f   : > { %2596 = vset.pattern.permute.xlu0 %v2734_v0  ;;  %2275 = vmatprep.subr.bf16.mxu0 %v2735_v1  ;;  %v266_v4 = vld [vmem:[#allocation2 + $0x8] sm:$0xff]  ;;  %v294_v6 = vand.u32 4294901760, %v265_v3  ;;  %v267_v8 = vld [vmem:[#allocation2 + $0x10] sm:$0xff]  ;;  %v268_v9 = vld [vmem:[#allocation2 + $0x18] sm:$0xff]  ;;  %v2736_v25 = vmov 1   ;;  %vm289_vm0 = vcmask 1043456  }
  0x50   : > { %s247_s30 = scalar_select %p246_p10, %s2791_s22, 1  ;;  %2257 = vmatprep.subr.bf16.mxu1 %v2735_v1  ;;  %v297_v7 = vand.u32 4294901760, %v266_v4  ;;  %v269_v10 = vld [vmem:[#allocation2 + $0x20] sm:$0xff]  ;;  %v300_v11 = vand.u32 4294901760, %v267_v8  ;;  %v303_v12 = vand.u32 4294901760, %v268_v9  ;;  %v270_v13 = vld [vmem:[#allocation2 + $0x28] sm:$0xff] }
  0x51   : > { %v306_v14 = vand.u32 4294901760, %v269_v10  ;;  %v2897_v15 = vld [vmem:[#allocation2 + $0x30] sm:$0xff]  ;;  %v2899_v16 = vld [vmem:[#allocation2 + $0x38] sm:$0xff]  ;;  %v2901_v17 = vsub.f32 %v265_v3, %v294_v6  ;;  %v309_v19 = vand.u32 4294901760, %v270_v13  ;;  %v273_v46 = vld [vmem:[#allocation2 + $0x40] sm:$0xff]  ;;  %vm2737_vm1 = vmmov 0  }
  0x52   : > { %s1676_s8 = sshll.u32 %s247_s30, 3  ;;  %v2903_v18 = vsub.f32 %v266_v4, %v297_v7  ;;  %v2905_v20 = vpack.c.bf16 %v297_v7, %v294_v6  ;;  %v2907_v21 = vsub.f32 %v267_v8, %v300_v11  ;;  %v2909_v22 = vsub.f32 %v268_v9, %v303_v12  ;;  %v274_v47 = vld [vmem:[#allocation2 + $0x48] sm:$0xff]  ;;  %v275_v50 = vld [vmem:[#allocation2 + $0x50] sm:$0xff]  ;;  %v276_v55 = vld [vmem:[#allocation2 + $0x58] sm:$0xff]  ;;  %s243_s14 = sand.u32 1, %s2720_s19  }
  0x53   : > { %s249_s26 = scalar_lea.vmem %s3397_s0, %s1676_s8  ;;  %v2911_v23 = vsub.f32 %v269_v10, %v306_v14  ;;  %v312_v24 = vand.u32 4294901760, %v2897_v15  ;;  %v384_v26 = vand.u32 4294901760, %v2901_v17  ;;  %v2916_v28 = vsub.f32 %v270_v13, %v309_v19  ;;  %v277_v59 = vld [vmem:[#allocation2 + $0x60] sm:$0xf]  ;;  %s1675_s15 = sshll.u32 %s243_s14, 3 }
  0x54   : > { %v252_v2 = vld [vmem:[%s249_s26] sm:$0xff]  ;;  %v391_v27 = vand.u32 4294901760, %v2903_v18  ;;  %2259 = vmatpush3.bf16.msra.mxu1 %v2905_v20  ;;  %v315_v29 = vand.u32 4294901760, %v2899_v16  ;;  %v398_v30 = vand.u32 4294901760, %v2907_v21  ;;  %v405_v31 = vand.u32 4294901760, %v2909_v22  ;;  %s1684_s16 = sshll.u32 %s2791_s22, 7 }
  0x55   : > { %254 = vperm.xlu0 %2596, %v252_v2   ;;  %v257_v5 = vadd.s32 50, %v252_v2  ;;  %v412_v32 = vand.u32 4294901760, %v2911_v23  ;;  %v2926_v33 = vsub.f32 %v2897_v15, %v312_v24  ;;  %2260 = vmatprep.subr.bf16.mxu1 %v2735_v1  ;;  %v385_v34 = vsub.f32 %v2901_v17, %v384_v26  ;;  %s245_s17 = scalar_lea.vmem [#allocation7], %s1675_s15  ;;  %s3355_s30 = scalar_lea.hbm %s3402_s5, %s1684_s16 }
  0x56   : > { %v392_v35 = vsub.f32 %v2903_v18, %v391_v27  ;;  %v419_v36 = vand.u32 4294901760, %v2916_v28  ;;  %v2937_v37 = vsub.f32 %v2899_v16, %v315_v29  ;;  %v399_v38 = vsub.f32 %v2907_v21, %v398_v30  ;;  %s1586_s7 = sshll.u32 %s245_s17, 4  ;;  %s1573_s8 = scalar_lea.sflag [#allocation4], %s243_s14  ;;  %s3357_s7 = int_to_ptr.vmem [resolvable:$true] %s1586_s7 }
  0x57   : > { %v406_v39 = vsub.f32 %v2909_v22, %v405_v31  ;;  %v413_v40 = vsub.f32 %v2911_v23, %v412_v32  ;;  %v426_v41 = vand.u32 4294901760, %v2926_v33  ;;  %v386_v42 = vand.u32 4294901760, %v385_v34  ;;  %s2658_s10 = scalar_lea.vmem %s3357_s7, 128  ;;  %p3415_p1 = scmp.ne.s32.totalorder %s3406_s28, 0 }
  0x58   : > { %v393_v43 = vand.u32 4294901760, %v392_v35  ;;  %v420_v44 = vsub.f32 %v2916_v28, %v419_v36  ;;  %v433_v45 = vand.u32 4294901760, %v2937_v37  ;;  %v400_v48 = vand.u32 4294901760, %v399_v38  ;;  %p2659_p12 = scmp.ne.s32.totalorder %s3357_s7, %s2658_s10  ;;  %s2739_s22 = smov [#allocation7]  }
  0x59   : > { %2597 = vset.pattern.permute.xlu0 %v2736_v25  ;;  %v407_v49 = vand.u32 4294901760, %v406_v39  ;;  %v427_v52 = vsub.f32 %v2926_v33, %v426_v41  ;;  %v2959_v54 = vpack.c.bf16 %v303_v12, %v300_v11  ;;  %v414_v56 = vand.u32 4294901760, %v413_v40  ;;  %s2662_s25 = sshll.u32 %s2739_s22, 4  ;;  %s2663_s25 = int_to_ptr.vmem [resolvable:$false] %s2662_s25 }
  0x5a   : > { %259 = vperm.xlu0 %2597, %v257_v5   ;;  %v2276_v51 = vpack.c.bf16 %v393_v43, %v386_v42  ;;  %v434_v53 = vsub.f32 %v2937_v37, %v433_v45  ;;  %v318_v57 = vand.u32 4294901760, %v273_v46  ;;  %v321_v58 = vand.u32 4294901760, %v274_v47  ;;  %p2660_p2 = pnand %p2659_p12, %p3415_p1  ;;  %s2664_s26 = scalar_lea.vmem %s2663_s25, 256 }
  0x5b   : > { %v2279_v60 = vpack.c.bf16 %v407_v49, %v400_v48  ;;  %v421_v61 = vand.u32 4294901760, %v420_v44  ;;  %2262 = vmatpush3.bf16.msra.mxu1 %v2959_v54  ;;  %v2962_v62 = vpack.c.bf16 %v309_v19, %v306_v14  ;;  %v324_v63 = vand.u32 4294901760, %v275_v50  ;;  %p2665_p4 = scmp.lt.s32.totalorder %s3357_s7, %s2663_s25  ;;  %p2666_p7 = scmp.lt.s32.totalorder %s2664_s26, %s2658_s10 }
  0x5c   : > { %2277 = vmatpush3.bf16.msra.mxu0 %v2276_v51  ;;  %v2965_v0 = vsub.f32 %v273_v46, %v318_v57  ;;  %v2967_v2 = vsub.f32 %v274_v47, %v321_v58  ;;  %2263 = vmatprep.subr.bf16.mxu1 %v2735_v1  ;;  %v327_v3 = vand.u32 4294901760, %v276_v55  ;;  %v428_v4 = vand.u32 4294901760, %v427_v52  ;;  %p2661_p3 = pneg %p2660_p2 }
  0x5d   : > { %2278 = vmatprep.subr.bf16.mxu0 %v2735_v1  ;;  %v435_v5 = vand.u32 4294901760, %v434_v53  ;;  %v2970_v6 = vsub.f32 %v275_v50, %v324_v63  ;;  %v291_v7 = vsel %vm289_vm0, %v277_v59, 0  ;;  %v2282_v12 = vpack.c.bf16 %v421_v61, %v414_v56  ;;  %p2667_p8 = por %p2666_p7, %p2665_p4 }
  0x5e   : > { %v440_v8 = vand.u32 4294901760, %v2965_v0  ;;  %v447_v9 = vand.u32 4294901760, %v2967_v2  ;;  %v2974_v10 = vsub.f32 %v276_v55, %v327_v3  ;;  %v2976_v11 = vand.u32 4294901760, %v291_v7 }
  0x5f   : > { %2265 = vmatpush3.bf16.msra.mxu1 %v2962_v62  ;;  %v454_v13 = vand.u32 4294901760, %v2970_v6  ;;  %v2982_v14 = vpack.c.bf16 %v315_v29, %v312_v24  ;;  %v2285_v34 = vpack.c.bf16 %v435_v5, %v428_v4  ;;  %v2738_v35 = vmov 0.0   ;;  %p2668_p11 = pnand %p2667_p8, %p2661_p3 }
  0x60   : > { %2280 = vmatpush3.bf16.msra.mxu0 %v2279_v60  ;;  %v441_v16 = vsub.f32 %v2965_v0, %v440_v8  ;;  %v448_v19 = vsub.f32 %v2967_v2, %v447_v9  ;;  %v461_v25 = vand.u32 4294901760, %v2974_v10  ;;  %2266 = vmatprep.subr.bf16.mxu1 %v2735_v1  ;;  %v2294_v15 = vpack.c.bf16 %v2903_v18, %v2901_v17 }
  0x61   : > { %2281 = vmatprep.subr.bf16.mxu0 %v2735_v1  ;;  %1928 = vmatprep.mubr.msk.f32.mxu0 %vm2737_vm1, %v2738_v35  ;;  %v2297_v24 = vpack.c.bf16 %v2909_v22, %v2907_v21  ;;  %v455_v38 = vsub.f32 %v2970_v6, %v454_v13  ;;  %v2997_v39 = vsub.f32 %v291_v7, %v2976_v11  ;;  %vm285_vm4 = vcmask 818176   ;;  %v901_v7 = vld [vmem:[#allocation5 + $0x28] sm:$0xff] }
  0x62   : > { %v442_v29 = vand.u32 4294901760, %v441_v16  ;;  %v2999_v40 = vpack.c.bf16 %v321_v58, %v318_v57  ;;  %1899 = vmatprep.mubr.msk.f32.mxu1 %vm2737_vm1, %v2738_v35  ;;  %v449_v42 = vand.u32 4294901760, %v448_v19  ;;  %v462_v43 = vsub.f32 %v2974_v10, %v461_v25  ;;  %v903_v16 = vld [vmem:[#allocation5 + $0x38] sm:$0xff] }
  0x63   : > { %2268 = vmatpush3.bf16.msra.mxu1 %v2982_v14  ;;  %v2300_v44 = vpack.c.bf16 %v2916_v28, %v2911_v23  ;;  %v2303_v46 = vpack.c.bf16 %v2937_v37, %v2926_v33  ;;  %v2306_v47 = vpack.c.bf16 %v2967_v2, %v2965_v0  ;;  %v3013_v48 = vpack.c.bf16 %v327_v3, %v324_v63  ;;  %v897_v33 = vld [vmem:[#allocation5 + $0x8] sm:$0xff] }
  0x64   : > { %2283 = vmatpush3.bf16.msra.mxu0 %v2282_v12  ;;  %2269 = vmatprep.subr.bf16.mxu1 %v2735_v1  ;;  %v2288_v49 = vpack.c.bf16 %v449_v42, %v442_v29  ;;  %v456_v50 = vand.u32 4294901760, %v455_v38  ;;  %v463_v51 = vand.u32 4294901760, %v462_v43  ;;  %v468_v52 = vand.u32 4294901760, %v2997_v39  ;;  %v904_v38 = vld [vmem:[#allocation5 + $0x40] sm:$0xff] }
  0x65   : > { %2284 = vmatprep.subr.bf16.mxu0 %v2735_v1  ;;  %v2309_v53 = vpack.c.bf16 %v2974_v10, %v2970_v6  ;;  %v2330_v58 = vpack.c.bf16 %v391_v27, %v384_v26  ;;  %v2333_v59 = vpack.c.bf16 %v405_v31, %v398_v30  ;;  %v2336_v60 = vpack.c.bf16 %v419_v36, %v412_v32  ;;  %v896_v32 = vld [vmem:[#allocation5] sm:$0xff] }
  0x66   : > { %v2291_v55 = vpack.c.bf16 %v463_v51, %v456_v50  ;;  %v469_v56 = vsub.f32 %v2997_v39, %v468_v52  ;;  %v2339_v61 = vpack.c.bf16 %v433_v45, %v426_v41  ;;  %v2342_v63 = vpack.c.bf16 %v447_v9, %v440_v8  ;;  %v899_v41 = vld [vmem:[#allocation5 + $0x18] sm:$0xff]  ;;  %v900_v6 = vld [vmem:[#allocation5 + $0x20] sm:$0xff] }
  0x67   : > { %2271 = vmatpush3.bf16.msra.mxu1 %v2999_v40  ;;  %v2345_v17 = vpack.c.bf16 %v461_v25, %v454_v13  ;;  %v250_v0 = vlaneseq  ;;  %v920_v36 = vand.u32 4294901760, %v896_v32  ;;  %v923_v37 = vand.u32 4294901760, %v897_v33 }
  0x68   : > { %2286 = vmatpush3.bf16.msra.mxu0 %v2285_v34  ;;  %2272 = vmatprep.subr.bf16.mxu1 %v2735_v1  ;;  %v470_v57 = vand.u32 4294901760, %v469_v56  ;;  %v929_v2 = vand.u32 4294901760, %v899_v41  ;;  %v932_v9 = vand.u32 4294901760, %v900_v6  ;;  %v935_v10 = vand.u32 4294901760, %v901_v7 }
  0x69   : > { %2287 = vmatprep.subr.bf16.mxu0 %v2735_v1  ;;  %v251_v26 = vand.u32 127, %v250_v0  ;;  %v3107_v45 = vsub.f32 %v896_v32, %v920_v36  ;;  %v3128_v12 = vpack.c.bf16 %v923_v37, %v920_v36  ;;  %v941_v34 = vand.u32 4294901760, %v903_v16 }
  0x6a   : > { %v3117_v5 = vsub.f32 %v899_v41, %v929_v2  ;;  %v3130_v13 = vsub.f32 %v900_v6, %v932_v9  ;;  %v944_v42 = vand.u32 4294901760, %v904_v38 }
  0x6b   : > { %2274 = vmatpush3.bf16.msra.mxu1 %v3013_v48  ;;  %v3143_v29 = vsub.f32 %v903_v16, %v941_v34 }
  0x6c   : > { %2289 = vmatpush3.bf16.msra.mxu0 %v2288_v49  ;;  %1897 = vmatprep.subr.mxu1 %v2738_v35  ;;  %v907_v49 = vld [vmem:[#allocation5 + $0x58] sm:$0xff] }
  0x6d   : > { %2290 = vmatprep.subr.bf16.mxu0 %v2735_v1 }
  0x6f   : > { %1898 = vmatpush3.msra.mxu1 %v2976_v11 }
  0x70   : > { %2292 = vmatpush3.bf16.msra.mxu0 %v2291_v55  ;;  %2413 = vmatprep.subr.bf16.mxu1 %v2735_v1 }
  0x71   : > { %1926 = vmatprep.subr.mxu0 %v2738_v35 }
  0x74   : > { %1927 = vmatpush3.msra.mxu0 %v470_v57  ;;  %v908_v57 = vld [vmem:[#allocation5 + $0x60] sm:$0xff] }
  0x75   : > { %2293 = vmatprep.subr.bf16.mxu0 %v2735_v1 }
  0xd4   : > { %v255_v18 = vpop.permute.xlu0 %254 }
  0xd5   : > { %vm256_vm2 = vcmp.eq.s32.totalorder %v251_v26, %v255_v18 }
  0xd9   : > { %v260_v27 = vpop.permute.xlu0 %259 }
  0xda   : > { %vm261_vm3 = vcmp.eq.s32.totalorder %v251_v26, %v260_v27 }
  0xdb   : > { %vm262_vm5 = vmor %vm256_vm2, %vm261_vm3 }
  0xdc   : > { %v3048_v21 = vsel %vm262_vm5, 1.0, %v2738_v35 }
  0xdd   : > { %v287_v22 = vsel %vm285_vm4, %v3048_v21, 0  ;;  %1929 = vmatmul.mubr.msk.f32.vlgmr.msra.gmra.mrb[0].mxu0 %vm285_vm4, %v3048_v21 }
  0xde   : > { %v372_v23 = vsub.f32 %v287_v22, %v287_v22  ;;  %2295 = vmatpush3.bf16.msra.mxu0 %v2294_v15  ;;  %1957 = vmatprep.mubr.msk.f32.mxu0 %vm2737_vm1, %v2738_v35  ;;  %v911_v22 = vld [vmem:[#allocation5 + $0x78] sm:$0xff] }
  0xdf   : > { %2296 = vmatprep.subr.bf16.mxu0 %v2735_v1 }
  0xe0   : > { %v373_v28 = vand.u32 4294901760, %v372_v23 }
  0xe2   : > { %2298 = vmatpush3.bf16.msra.mxu0 %v2297_v24  ;;  %v374_v30 = vsub.f32 %v372_v23, %v373_v28 }
  0xe3   : > { %2299 = vmatprep.subr.bf16.mxu0 %v2735_v1 }
  0xe4   : > { %v375_v31 = vand.u32 4294901760, %v374_v30 }
  0xe6   : > { %2301 = vmatpush3.bf16.msra.mxu0 %v2300_v44  ;;  %1900 = vmatmul.mubr.f32.vlgmr.msra.gmra.mrb[0].mxu1 %v375_v31  ;;  %v3150_v44 = vpack.c.bf16 %v935_v10, %v932_v9 }
  0xe7   : > { %2302 = vmatprep.subr.bf16.mxu0 %v2735_v1  ;;  %2149 = vmatprep.mubr.msk.f32.mxu1 %vm2737_vm1, %v2738_v35 }
  0xea   : > { %2304 = vmatpush3.bf16.msra.mxu0 %v2303_v46  ;;  %v3152_v46 = vsub.f32 %v904_v38, %v944_v42  ;;  %v1034_v38 = vand.u32 4294901760, %v3117_v5 }
  0xeb   : > { %2305 = vmatprep.subr.bf16.mxu0 %v2735_v1 }
  0xee   : > { %2307 = vmatpush3.bf16.msra.mxu0 %v2306_v47 }
  0xef   : > { %2308 = vmatprep.subr.bf16.mxu0 %v2735_v1 }
  0xf2   : > { %2310 = vmatpush3.bf16.msra.mxu0 %v2309_v53 }
  0xf3   : > { %1955 = vmatprep.subr.mxu0 %v2738_v35 }
  0xf6   : > { %1956 = vmatpush3.msra.mxu0 %v2997_v39  ;;  %v905_v39 = vld [vmem:[#allocation5 + $0x48] sm:$0xff] }
  0xf7   : > { %1958 = vmatmul.mubr.f32.vlgmr.msra.gmra.mrb[0].mxu0 %v372_v23  ;;  %2311 = vmatprep.subr.bf16.mxu0 %v2735_v1  ;;  %v947_v43 = vand.u32 4294901760, %v905_v39 }
  0xf8   : > { %2313 = vmatpush3.bf16.msra.mxu0 %v2905_v20  ;;  %1986 = vmatprep.mubr.msk.f32.mxu0 %vm2737_vm1, %v2738_v35 }
  0xf9   : > { %2314 = vmatprep.subr.bf16.mxu0 %v2735_v1  ;;  %v3154_v47 = vsub.f32 %v905_v39, %v947_v43 }
  0xfb   : > { %v2426_v50 = vpack.c.bf16 %v3154_v47, %v3152_v46 }
  0xfc   : > { %2316 = vmatpush3.bf16.msra.mxu0 %v2959_v54 }
  0xfd   : > { %2317 = vmatprep.subr.bf16.mxu0 %v2735_v1 }
 0x100   : > { %2319 = vmatpush3.bf16.msra.mxu0 %v2962_v62 }
 0x101   : > { %2320 = vmatprep.subr.bf16.mxu0 %v2735_v1 }
 0x104   : > { %2322 = vmatpush3.bf16.msra.mxu0 %v2982_v14 }
 0x105   : > { %2323 = vmatprep.subr.bf16.mxu0 %v2735_v1 }
 0x108   : > { %2325 = vmatpush3.bf16.msra.mxu0 %v2999_v40 }
 0x109   : > { %2326 = vmatprep.subr.bf16.mxu0 %v2735_v1 }
 0x10c   : > { %2328 = vmatpush3.bf16.msra.mxu0 %v3013_v48 }
 0x10d   : > { %1984 = vmatprep.subr.mxu0 %v2738_v35 }
 0x110   : > { %1985 = vmatpush3.msra.mxu0 %v2976_v11 }
 0x111   : > { %1987 = vmatmul.mubr.f32.vlgmr.msra.gmra.mrb[0].mxu0 %v373_v28  ;;  %2329 = vmatprep.subr.bf16.mxu0 %v2735_v1  ;;  %v965_v28 = vand.u32 4294901760, %v911_v22 }
 0x112   : > { %2331 = vmatpush3.bf16.msra.mxu0 %v2330_v58  ;;  %2015 = vmatprep.mubr.msk.f32.mxu0 %vm2737_vm1, %v2738_v35  ;;  %v909_v58 = vld [vmem:[#allocation5 + $0x68] sm:$0xff] }
 0x113   : > { %2332 = vmatprep.subr.bf16.mxu0 %v2735_v1  ;;  %v3194_v31 = vsub.f32 %v911_v22, %v965_v28  ;;  %v1062_v22 = vand.u32 4294901760, %v3143_v29 }
 0x116   : > { %2334 = vmatpush3.bf16.msra.mxu0 %v2333_v59 }
 0x117   : > { %2335 = vmatprep.subr.bf16.mxu0 %v2735_v1 }
 0x11a   : > { %2337 = vmatpush3.bf16.msra.mxu0 %v2336_v60  ;;  %v956_v60 = vand.u32 4294901760, %v908_v57 }
 0x11b   : > { %2338 = vmatprep.subr.bf16.mxu0 %v2735_v1 }
 0x11e   : > { %2340 = vmatpush3.bf16.msra.mxu0 %v2339_v61  ;;  %v959_v61 = vand.u32 4294901760, %v909_v58 }
 0x11f   : > { %2341 = vmatprep.subr.bf16.mxu0 %v2735_v1 }
 0x120   : > { %v3176_v0 = vsub.f32 %v909_v58, %v959_v61  ;;  %v3188_v27 = vpack.c.bf16 %v959_v61, %v956_v60 }
 0x122   : > { %2343 = vmatpush3.bf16.msra.mxu0 %v2342_v63  ;;  %v3172_v63 = vpack.c.bf16 %v947_v43, %v944_v42 }
 0x123   : > { %2344 = vmatprep.subr.bf16.mxu0 %v2735_v1 }
 0x126   : > { %2346 = vmatpush3.bf16.msra.mxu0 %v2345_v17  ;;  %v3174_v17 = vsub.f32 %v908_v57, %v956_v60 }
 0x127   : > { %2013 = vmatprep.subr.mxu0 %v2738_v35 }
 0x128   : > { %v2432_v18 = vpack.c.bf16 %v3176_v0, %v3174_v17 }
 0x12a   : > { %2014 = vmatpush3.msra.mxu0 %v468_v52  ;;  %v953_v52 = vand.u32 4294901760, %v907_v49 }
 0x12b   : > { %2016 = vmatmul.mubr.msk.f32.vlgmr.msra.gmra.mrb[0].mxu0 %vm285_vm4, %v3048_v21  ;;  %2347 = vmatprep.subr.bf16.mxu0 %v2735_v1 }
 0x12c   : > { %2349 = vmatpush3.bf16.msra.mxu0 %v2905_v20  ;;  %2044 = vmatprep.mubr.msk.f32.mxu0 %vm2737_vm1, %v2738_v35  ;;  %v898_v20 = vld [vmem:[#allocation5 + $0x10] sm:$0xff]  ;;  %v3165_v56 = vsub.f32 %v907_v49, %v953_v52 }
 0x12d   : > { %2350 = vmatprep.subr.bf16.mxu0 %v2735_v1 }
 0x130   : > { %2352 = vmatpush3.bf16.msra.mxu0 %v2959_v54  ;;  %v3109_v54 = vsub.f32 %v897_v33, %v923_v37  ;;  %v1678_v37 = vld [vmem:[%s3399_s2] ss:$0 sm:$0xff] }
 0x131   : > { %2353 = vmatprep.subr.bf16.mxu0 %v2735_v1 }
 0x132   : > { %v2414_v3 = vpack.c.bf16 %v3109_v54, %v3107_v45 }
 0x134   : > { %2355 = vmatpush3.bf16.msra.mxu0 %v2962_v62  ;;  %v926_v62 = vand.u32 4294901760, %v898_v20  ;;  %2415 = vmatpush3.bf16.xpose.msra.mxu1 %v2414_v3  ;;  %v1020_v3 = vand.u32 4294901760, %v3109_v54 }
 0x135   : > { %2356 = vmatprep.subr.bf16.mxu0 %v2735_v1  ;;  %2416 = vmatprep.subr.bf16.mxu1 %v2735_v1 }
 0x136   : > { %v3115_v4 = vsub.f32 %v898_v20, %v926_v62  ;;  %v3139_v15 = vpack.c.bf16 %v929_v2, %v926_v62  ;;  %v1013_v2 = vand.u32 4294901760, %v3107_v45 }
 0x138   : > { %2358 = vmatpush3.bf16.msra.mxu0 %v2982_v14  ;;  %v2417_v8 = vpack.c.bf16 %v3117_v5, %v3115_v4  ;;  %v3132_v14 = vsub.f32 %v901_v7, %v935_v10  ;;  %v1014_v9 = vsub.f32 %v3107_v45, %v1013_v2  ;;  %v1021_v10 = vsub.f32 %v3109_v54, %v1020_v3 }
 0x139   : > { %2359 = vmatprep.subr.bf16.mxu0 %v2735_v1 }
 0x13a   : > { %v2420_v19 = vpack.c.bf16 %v3132_v14, %v3130_v13  ;;  %v1048_v57 = vand.u32 4294901760, %v3132_v14 }
 0x13c   : > { %2361 = vmatpush3.bf16.msra.mxu0 %v2999_v40  ;;  %2418 = vmatpush3.bf16.xpose.msra.mxu1 %v2417_v8  ;;  %v1049_v60 = vsub.f32 %v3132_v14, %v1048_v57 }
 0x13d   : > { %2362 = vmatprep.subr.bf16.mxu0 %v2735_v1  ;;  %2419 = vmatprep.subr.bf16.mxu1 %v2735_v1 }
 0x140   : > { %2364 = vmatpush3.bf16.msra.mxu0 %v3013_v48  ;;  %v906_v48 = vld [vmem:[#allocation5 + $0x50] sm:$0xff] }
 0x141   : > { %2042 = vmatprep.subr.mxu0 %v2738_v35  ;;  %v950_v51 = vand.u32 4294901760, %v906_v48 }
 0x143   : > { %v3163_v55 = vsub.f32 %v906_v48, %v950_v51  ;;  %v3183_v26 = vpack.c.bf16 %v953_v52, %v950_v51  ;;  %v1035_v48 = vsub.f32 %v3117_v5, %v1034_v38  ;;  %v1041_v52 = vand.u32 4294901760, %v3130_v13 }
 0x144   : > { %2043 = vmatpush3.msra.mxu0 %v2976_v11  ;;  %v902_v11 = vld [vmem:[#allocation5 + $0x30] sm:$0xff]  ;;  %2421 = vmatpush3.bf16.xpose.msra.mxu1 %v2420_v19  ;;  %v1015_v19 = vand.u32 4294901760, %v1014_v9 }
 0x145   : > { %2045 = vmatmul.mubr.msk.f32.vlgmr.msra.gmra.mrb[0].mxu0 %vm285_vm4, %v3048_v21  ;;  %2365 = vmatprep.subr.bf16.mxu0 %v2735_v1  ;;  %v938_v25 = vand.u32 4294901760, %v902_v11  ;;  %v2429_v59 = vpack.c.bf16 %v3165_v56, %v3163_v55  ;;  %v910_v21 = vld [vmem:[#allocation5 + $0x70] sm:$0xff]  ;;  %v1036_v51 = vand.u32 4294901760, %v1035_v48  ;;  %v2468_v45 = vpack.c.bf16 %v1048_v57, %v1041_v52 }
 0x146   : > { %2079 = vmatprep.mubr.msk.f32.mxu0 %vm2737_vm1, %v2738_v35  ;;  %2422 = vmatprep.subr.bf16.mxu1 %v2735_v1  ;;  %v962_v23 = vand.u32 4294901760, %v910_v21 }
 0x147   : > { %v3141_v24 = vsub.f32 %v902_v11, %v938_v25  ;;  %v3161_v53 = vpack.c.bf16 %v941_v34, %v938_v25  ;;  %v1022_v25 = vand.u32 4294901760, %v1021_v10  ;;  %v1027_v34 = vand.u32 4294901760, %v3115_v4 }
 0x148   : > { %v3192_v30 = vsub.f32 %v910_v21, %v962_v23  ;;  %v3199_v33 = vpack.c.bf16 %v965_v28, %v962_v23  ;;  %v1083_v10 = vand.u32 4294901760, %v3163_v55 }
 0x149   : > { %v2423_v40 = vpack.c.bf16 %v3143_v29, %v3141_v24  ;;  %v2390_v42 = vpack.c.bf16 %v1022_v25, %v1015_v19  ;;  %v1028_v43 = vsub.f32 %v3115_v4, %v1027_v34  ;;  %v1055_v21 = vand.u32 4294901760, %v3141_v24 }
 0x14a   : > { %v2435_v32 = vpack.c.bf16 %v3194_v31, %v3192_v30  ;;  %v1090_v19 = vand.u32 4294901760, %v3165_v56 }
 0x14b   : > { %2367 = vmatpush3.bf16.xpose.msra.mxu0 %v3128_v12  ;;  %v1056_v28 = vsub.f32 %v3141_v24, %v1055_v21  ;;  %v2471_v54 = vpack.c.bf16 %v1062_v22, %v1055_v21 }
 0x14c   : > { %2368 = vmatprep.subr.bf16.mxu0 %v2735_v1  ;;  %2424 = vmatpush3.bf16.xpose.msra.mxu1 %v2423_v40  ;;  %v2477_v5 = vpack.c.bf16 %v1090_v19, %v1083_v10 }
 0x14d   : > { %2425 = vmatprep.subr.bf16.mxu1 %v2735_v1 }
 0x153   : > { %2370 = vmatpush3.bf16.xpose.msra.mxu0 %v3139_v15 }
 0x154   : > { %2371 = vmatprep.subr.bf16.mxu0 %v2735_v1  ;;  %2427 = vmatpush3.bf16.xpose.msra.mxu1 %v2426_v50  ;;  %v1029_v50 = vand.u32 4294901760, %v1028_v43 }
 0x155   : > { %2428 = vmatprep.subr.bf16.mxu1 %v2735_v1 }
 0x156   : > { %v2393_v58 = vpack.c.bf16 %v1036_v51, %v1029_v50  ;;  %v1104_v50 = vand.u32 4294901760, %v3176_v0 }
 0x15b   : > { %2373 = vmatpush3.bf16.xpose.msra.mxu0 %v3150_v44 }
 0x15c   : > { %2374 = vmatprep.subr.bf16.mxu0 %v2735_v1  ;;  %2430 = vmatpush3.bf16.xpose.msra.mxu1 %v2429_v59  ;;  %v1042_v59 = vsub.f32 %v3130_v13, %v1041_v52 }
 0x15d   : > { %2431 = vmatprep.subr.bf16.mxu1 %v2735_v1 }
 0x15e   : > { %v1043_v61 = vand.u32 4294901760, %v1042_v59 }
 0x163   : > { %2376 = vmatpush3.bf16.xpose.msra.mxu0 %v3161_v53 }
 0x164   : > { %2377 = vmatprep.subr.bf16.mxu0 %v2735_v1  ;;  %2433 = vmatpush3.bf16.xpose.msra.mxu1 %v2432_v18  ;;  %v1050_v18 = vand.u32 4294901760, %v1049_v60  ;;  %v1111_v60 = vand.u32 4294901760, %v3192_v30 }
 0x165   : > { %2434 = vmatprep.subr.bf16.mxu1 %v2735_v1 }
 0x166   : > { %v2396_v23 = vpack.c.bf16 %v1050_v18, %v1043_v61  ;;  %v1118_v61 = vand.u32 4294901760, %v3194_v31 }
 0x168   : > { %v2483_v14 = vpack.c.bf16 %v1118_v61, %v1111_v60 }
 0x16b   : > { %2379 = vmatpush3.bf16.xpose.msra.mxu0 %v3172_v63 }
 0x16c   : > { %2380 = vmatprep.subr.bf16.mxu0 %v2735_v1  ;;  %2436 = vmatpush3.bf16.xpose.msra.mxu1 %v2435_v32  ;;  %v1063_v32 = vsub.f32 %v3143_v29, %v1062_v22 }
 0x16d   : > { %2437 = vmatprep.subr.bf16.mxu1 %v2735_v1 }
 0x173   : > { %2382 = vmatpush3.bf16.xpose.msra.mxu0 %v3183_v26 }
 0x174   : > { %2383 = vmatprep.subr.bf16.mxu0 %v2735_v1 }
 0x17b   : > { %2385 = vmatpush3.bf16.xpose.msra.mxu0 %v3188_v27 }
 0x17c   : > { %2386 = vmatprep.subr.bf16.mxu0 %v2735_v1 }
 0x183   : > { %2388 = vmatpush3.bf16.xpose.msra.mxu0 %v3199_v33 }
 0x184   : > { %2389 = vmatprep.subr.bf16.mxu0 %v2735_v1 }
 0x1b9   : > { %v377_v20 = vpop.f32.mrb[0].mxu1 }
 0x1ba   : > { %v1901_v36 = vpop.f32.mrb[1].mxu1  ;;  %v378_v41 = vadd.f32 %v1678_v37, %v377_v20  ;;  %v1057_v20 = vand.u32 4294901760, %v1056_v28  ;;  %v1069_v37 = vand.u32 4294901760, %v3152_v46 }
 0x1bb   : > { %v1064_v36 = vand.u32 4294901760, %v1063_v32 }
 0x218   : > { %v891_v62 = vpop.f32.mrb[0].mxu0 }
 0x219   : > { %v2510_v6 = vadd.f32 %v891_v62, %v378_v41  ;;  %v2046_v7 = vpop.f32.mrb[1].mxu0  ;;  %v1076_v41 = vand.u32 4294901760, %v3154_v47  ;;  %v2399_v62 = vpack.c.bf16 %v1064_v36, %v1057_v20  ;;  %v2462_v20 = vpack.c.bf16 %v1020_v3, %v1013_v2 }
 0x21b   : > { %v895_v8 = vmax.f32 %v2510_v6, 0.0  ;;  %v1070_v6 = vsub.f32 %v3152_v46, %v1069_v37  ;;  %v1077_v7 = vsub.f32 %v3154_v47, %v1076_v41  ;;  %v2474_v4 = vpack.c.bf16 %v1076_v41, %v1069_v37 }
 0x21d   : > { %v3214_v11 = vand.u32 4294901760, %v895_v8  ;;  %v1078_v9 = vand.u32 4294901760, %v1077_v7 }
 0x21f   : > { %v3217_v16 = vsub.f32 %v895_v8, %v3214_v11  ;;  %v1071_v8 = vand.u32 4294901760, %v1070_v6 }
 0x221   : > { %v1002_v39 = vand.u32 4294901760, %v3217_v16  ;;  %2150 = vmatmul.mubr.f32.vlgmr.msra.gmra.mrb[2].mxu1 %v3217_v16  ;;  %v2402_v25 = vpack.c.bf16 %v1078_v9, %v1071_v8 }
 0x222   : > { %2439 = vmatpush3.bf16.xpose.msra.mxu1 %v3128_v12  ;;  %2184 = vmatprep.mubr.msk.f32.mxu1 %vm2737_vm1, %v2738_v35 }
 0x223   : > { %v1003_v40 = vsub.f32 %v3217_v16, %v1002_v39  ;;  %2440 = vmatprep.subr.bf16.mxu1 %v2735_v1 }
 0x225   : > { %v1004_v49 = vand.u32 4294901760, %v1003_v40  ;;  %v1084_v40 = vsub.f32 %v3163_v55, %v1083_v10  ;;  %v1105_v55 = vsub.f32 %v3176_v0, %v1104_v50 }
 0x227   : > { %2080 = vmatmul.mubr.f32.vlgmr.msra.gmra.mrb[2].mxu0 %v1004_v49  ;;  %v1085_v43 = vand.u32 4294901760, %v1084_v40  ;;  %v1097_v49 = vand.u32 4294901760, %v3174_v17  ;;  %v1106_v59 = vand.u32 4294901760, %v1105_v55 }
 0x228   : > { %2391 = vmatpush3.bf16.xpose.msra.mxu0 %v2390_v42  ;;  %2114 = vmatprep.mubr.msk.f32.mxu0 %vm2737_vm1, %v2738_v35  ;;  %v1091_v42 = vsub.f32 %v3165_v56, %v1090_v19 }
 0x229   : > { %2392 = vmatprep.subr.bf16.mxu0 %v2735_v1  ;;  %v2480_v13 = vpack.c.bf16 %v1104_v50, %v1097_v49 }
 0x22a   : > { %2442 = vmatpush3.bf16.xpose.msra.mxu1 %v3139_v15  ;;  %v1092_v48 = vand.u32 4294901760, %v1091_v42 }
 0x22b   : > { %2443 = vmatprep.subr.bf16.mxu1 %v2735_v1 }
 0x22c   : > { %v2405_v51 = vpack.c.bf16 %v1092_v48, %v1085_v43 }
 0x230   : > { %2394 = vmatpush3.bf16.xpose.msra.mxu0 %v2393_v58  ;;  %v1098_v58 = vsub.f32 %v3174_v17, %v1097_v49  ;;  %v1119_v17 = vsub.f32 %v3194_v31, %v1118_v61 }
 0x231   : > { %2395 = vmatprep.subr.bf16.mxu0 %v2735_v1 }
 0x232   : > { %2445 = vmatpush3.bf16.xpose.msra.mxu1 %v3150_v44  ;;  %v1099_v56 = vand.u32 4294901760, %v1098_v58  ;;  %v1120_v28 = vand.u32 4294901760, %v1119_v17 }
 0x233   : > { %2446 = vmatprep.subr.bf16.mxu1 %v2735_v1 }
 0x234   : > { %v2408_v18 = vpack.c.bf16 %v1106_v59, %v1099_v56 }
 0x238   : > { %2397 = vmatpush3.bf16.xpose.msra.mxu0 %v2396_v23  ;;  %v1112_v23 = vsub.f32 %v3192_v30, %v1111_v60  ;;  %v2465_v30 = vpack.c.bf16 %v1034_v38, %v1027_v34 }
 0x239   : > { %2398 = vmatprep.subr.bf16.mxu0 %v2735_v1 }
 0x23a   : > { %2448 = vmatpush3.bf16.xpose.msra.mxu1 %v3161_v53  ;;  %v1113_v0 = vand.u32 4294901760, %v1112_v23 }
 0x23b   : > { %2449 = vmatprep.subr.bf16.mxu1 %v2735_v1 }
 0x23c   : > { %v2411_v32 = vpack.c.bf16 %v1120_v28, %v1113_v0 }
 0x240   : > { %2400 = vmatpush3.bf16.xpose.msra.mxu0 %v2399_v62 }
 0x241   : > { %2401 = vmatprep.subr.bf16.mxu0 %v2735_v1 }
 0x242   : > { %2451 = vmatpush3.bf16.xpose.msra.mxu1 %v3172_v63 }
 0x243   : > { %2452 = vmatprep.subr.bf16.mxu1 %v2735_v1 }
 0x248   : > { %2403 = vmatpush3.bf16.xpose.msra.mxu0 %v2402_v25 }
 0x249   : > { %2404 = vmatprep.subr.bf16.mxu0 %v2735_v1 }
 0x24a   : > { %2454 = vmatpush3.bf16.xpose.msra.mxu1 %v3183_v26 }
 0x24b   : > { %2455 = vmatprep.subr.bf16.mxu1 %v2735_v1 }
 0x250   : > { %2406 = vmatpush3.bf16.xpose.msra.mxu0 %v2405_v51 }
 0x251   : > { %2407 = vmatprep.subr.bf16.mxu0 %v2735_v1 }
 0x252   : > { %2457 = vmatpush3.bf16.xpose.msra.mxu1 %v3188_v27 }
 0x253   : > { %2458 = vmatprep.subr.bf16.mxu1 %v2735_v1 }
 0x258   : > { %2409 = vmatpush3.bf16.xpose.msra.mxu0 %v2408_v18 }
 0x259   : > { %2410 = vmatprep.subr.bf16.mxu0 %v2735_v1 }
 0x25a   : > { %2460 = vmatpush3.bf16.xpose.msra.mxu1 %v3199_v33 }
 0x25b   : > { %2461 = vmatprep.subr.bf16.mxu1 %v2735_v1 }
 0x260   : > { %2412 = vmatpush3.bf16.xpose.msra.mxu0 %v2411_v32 }
 0x261   : > { %2185 = vmatmul.mubr.f32.vlgmr.msra.gmra.mrb[2].mxu1 %v1002_v39 }
 0x262   : > { %2463 = vmatpush3.bf16.xpose.msra.mxu1 %v2462_v20  ;;  %2219 = vmatprep.mubr.msk.f32.mxu1 %vm2737_vm1, %v2738_v35 }
 0x263   : > { %2464 = vmatprep.subr.bf16.mxu1 %v2735_v1 }
 0x267   : > { %2115 = vmatmul.mubr.f32.vlgmr.msra.gmra.mrb[2].mxu0 %v3214_v11 }
 0x26a   : > { %2466 = vmatpush3.bf16.xpose.msra.mxu1 %v2465_v30 }
 0x26b   : > { %2467 = vmatprep.subr.bf16.mxu1 %v2735_v1 }
 0x272   : > { %2469 = vmatpush3.bf16.xpose.msra.mxu1 %v2468_v45 }
 0x273   : > { %2470 = vmatprep.subr.bf16.mxu1 %v2735_v1 }
 0x27a   : > { %2472 = vmatpush3.bf16.xpose.msra.mxu1 %v2471_v54 }
 0x27b   : > { %2473 = vmatprep.subr.bf16.mxu1 %v2735_v1 }
 0x282   : > { %2475 = vmatpush3.bf16.xpose.msra.mxu1 %v2474_v4 }
 0x283   : > { %2476 = vmatprep.subr.bf16.mxu1 %v2735_v1 }
 0x28a   : > { %2478 = vmatpush3.bf16.xpose.msra.mxu1 %v2477_v5 }
 0x28b   : > { %2479 = vmatprep.subr.bf16.mxu1 %v2735_v1 }
 0x292   : > { %2481 = vmatpush3.bf16.xpose.msra.mxu1 %v2480_v13 }
 0x293   : > { %2482 = vmatprep.subr.bf16.mxu1 %v2735_v1 }
 0x29a   : > { %2484 = vmatpush3.bf16.xpose.msra.mxu1 %v2483_v14 }
 0x29b   : > { %2485 = vmatprep.subr.bf16.mxu1 %v2735_v1 }
 0x2a1   : > { %2220 = vmatmul.mubr.f32.vlgmr.msra.gmra.mrb[2].mxu1 %v3214_v11 }
 0x2a2   : > { %2487 = vmatpush3.bf16.xpose.msra.mxu1 %v3128_v12  ;;  %2254 = vmatprep.mubr.msk.f32.mxu1 %vm2737_vm1, %v2738_v35 }
 0x2a3   : > { %2488 = vmatprep.subr.bf16.mxu1 %v2735_v1 }
 0x2aa   : > { %2490 = vmatpush3.bf16.xpose.msra.mxu1 %v3139_v15  ;;  %v1682_v15 = vld [vmem:[%s3401_s4] ss:$0 sm:$0xff] }
 0x2ab   : > { %2491 = vmatprep.subr.bf16.mxu1 %v2735_v1 }
 0x2b2   : > { %2493 = vmatpush3.bf16.xpose.msra.mxu1 %v3150_v44 }
 0x2b3   : > { %2494 = vmatprep.subr.bf16.mxu1 %v2735_v1 }
 0x2ba   : > { %2496 = vmatpush3.bf16.xpose.msra.mxu1 %v3161_v53 }
 0x2bb   : > { %2497 = vmatprep.subr.bf16.mxu1 %v2735_v1 }
 0x2c2   : > { %2499 = vmatpush3.bf16.xpose.msra.mxu1 %v3172_v63 }
 0x2c3   : > { %2500 = vmatprep.subr.bf16.mxu1 %v2735_v1 }
 0x2ca   : > { %2502 = vmatpush3.bf16.xpose.msra.mxu1 %v3183_v26 }
 0x2cb   : > { %2503 = vmatprep.subr.bf16.mxu1 %v2735_v1 }
 0x2d2   : > { %2505 = vmatpush3.bf16.xpose.msra.mxu1 %v3188_v27 }
 0x2d3   : > { %2506 = vmatprep.subr.bf16.mxu1 %v2735_v1 }
 0x2da   : > { %2508 = vmatpush3.bf16.xpose.msra.mxu1 %v3199_v33 }
 0x2e1   : > { %2255 = vmatmul.mubr.f32.vlgmr.msra.gmra.mrb[2].mxu1 %v3214_v11 }
 0x33a   : > { %v1157_v35 = vpop.f32.mrb[2].mxu0 }
 0x33b   : > { %v2116_v12 = vpop.f32.mrb[3].mxu0  ;;  %v2511_v24 = vadd.f32 %v1682_v15, %v1157_v35 }
 0x3b4   : > { %v1556_v29 = vpop.f32.mrb[2].mxu1 }
 0x3b5   : > { %v2512_v44 = vadd.f32 %v2511_v24, %v1556_v29  ;;  %v2256_v46 = vpop.f32.mrb[3].mxu1 }
 0x3b7   : > { %1560 = vmax.xlane.f32.xlu1 %v2512_v44 }
 0x444   : > { %v1561_v47 = vpop.xlane.xlu1 %1560 }
 0x445   : > { %v1562_v53 = vsub.f32 %v2512_v44, %v1561_v47 }
 0x447   : > { %v1563_v1 = vmul.f32 1.442695, %v1562_v53 }
 0x449   : > { %2598 = vpow2.f32 %v1563_v1 }
 0x453   : > { %v2599_v63 = vpop.eup %2598 }
 0x454   : > { %1565 = vadd.xlane.f32.xlu1 %v2599_v63 }
 0x4e1   : > { %v1566_v26 = vpop.xlane.xlu1 %1565 }
 0x4e2   : > { %2600 = vlog2.f32 %v1566_v26 }
 0x4ec   : > { %v2601_v27 = vpop.eup %2600 }
 0x4ed   : > { %v1568_v31 = vmul.f32 0.6931472, %v2601_v27 }
 0x4ef   : > { %v1569_v33 = vadd.f32 %v1568_v31, %v1561_v47 }
 0x4f1   : > { %v1570_v2 = vsub.f32 %v2512_v44, %v1569_v33 }
 0x4f3   : > { %1571 = vst [vmem:[%s245_s17] sm:$0xff] %v1570_v2 }
 0x4f4   : > { %2671 = shalt.err (!%p2668_p11)
}
 0x4f5   : > { %s2672_s9 = scalar_lea.hbm %s3355_s30, 128  ;;  %s2676_s13 = scalar_lea.hbm %s3402_s5, 256 }
 0x4f6   : > { %p2673_p13 = scmp.ne.s32.totalorder %s3355_s30, %s2672_s9  ;;  %p2677_p6 = scmp.lt.u32.totalorder %s3355_s30, %s3402_s5 }
 0x4f7   : > { %p2678_p9 = scmp.lt.u32.totalorder %s2676_s13, %s2672_s9  ;;  %p2680_p12 = scmp.lt.u32.totalorder %s2672_s9, %s3355_s30 }
 0x4f8   : > { %p2674_p5 = pnand %p2673_p13, %p3415_p1 }
 0x4f9   : > { %p2679_p10 = por %p2678_p9, %p2677_p6 }
 0x4fa   : > { %p2675_p0 = pneg %p2674_p5 }
 0x4fb   : > { %p2681_p2 = por %p2680_p12, %p2679_p10 }
 0x4fd   : > { %p2682_p3 = pnand %p2681_p2, %p2675_p0 }
 0x4ff   : > { %2685 = shalt.err (!%p2682_p3)
}
 0x500   : > { %2537 = dma.vmem_to_hbm [thread:$0]  (%p3415_p1), %s3357_s7, 128, %s3355_s30, %s1573_s8  }
 0x501 PF: > { %p2554_p4 = scmp.ge.s32.totalorder %s2728_s21, 2  ;;  %s1598_s16 = sand.u32 1, %s2716_s18  }
 0x502   : > { %p3416_p7 = scmp.ne.s32.totalorder %s3407_s29, 0  ;;  %s1599_s17 = scalar_lea.sflag [#allocation4], %s1598_s16 }
 0x504   : > { %p2547_p8 = pnand %p2554_p4, %p3416_p7 }
 0x506   : > { %2711 = dma.done.wait (!%p2547_p8), %s1599_s17, 128  }
 0x507   : > { %2713 = vsyncadd (!%p2547_p8), %s1599_s17, 4294967168  ;;  %p17_p11 = scmp.ge.s32.totalorder %s2795_s24, 4   ;;  %s3417_s18 = smov %s2720_s19 }
 0x508   : > { %s3418_s19 = smov %s2724_s20  ;;  %s3419_s20 = smov %s2806_s27 }
 0x509   : > { %s3420_s21 = smov %s2795_s24  ;;  %19 = sbr.rel (!%p17_p11) target bundleno = 5 (0x5), region = 84 }
 0x510   :  { %1604 = vsyncpa [#allocation3], 1 }
 0x511   :  { %1606 = vsyncpa [#allocation3 + $0x1], 1 }
 0x512   :  { %1607 = vsyncpa [#allocation6], 1 }
 0x513   :  { %1608 = vsyncpa [#allocation4], 1 }
 0x514   :  { %1610 = vsyncpa [#allocation4 + $0x1], 1 }

</bundles_post_ra>
